<compile_context>
chip_gen: v7x
topology: tpu7x:2x2x1
jax: 0.10.0
libtpu: 0.0.40
codegen_flags: <defaults>
</compile_context>

<pallas_src>
import jax
import jax.numpy as jnp
from jax.experimental import pallas as pl
from jax.experimental.pallas import tpu as pltpu


_LANE = 128
_TILE_CAP_BYTES = 2 * 1024 * 1024   # per-array tile cap (~HBM roofline knee is ~1 MiB)
_TILE_MIN_BYTES = 1 * 1024 * 1024   # never shrink tiles below this just to add steps


def _relu_kernel(x_ref, o_ref):
    # Elementwise ReLU on the current VMEM tile (pure VPU work).
    o_ref[...] = jnp.maximum(x_ref[...], jnp.zeros((), x_ref.dtype))


def _min_sublane(dtype) -> int:
    nbytes = jnp.dtype(dtype).itemsize
    return {4: 8, 2: 16, 1: 32}.get(nbytes, 8)


def _round_up(a: int, b: int) -> int:
    return -(-a // b) * b


def _num_tensorcores() -> int:
    """Best-effort TensorCores-per-chip (v7x has 2; v5e/v6e have 1)."""
    try:
        kind = jax.devices()[0].device_kind.lower()
        if "v7" in kind or "tpu7" in kind:
            return 2
    except Exception:
        pass
    return 1


def _pick_2d_shape(shape, dtype, num_tc):
    """Reshape-only (rows, cols) factorization of the flat contiguous buffer.

    Lane-dense path (total % 128 == 0): cols is a multiple of 128, preferring
    ~512..4096 lanes while keeping rows >= min_sublane (and ideally enough
    rows for a multi-step grid).

    Ragged path: score contiguous prefix factorizations of the original shape
    by padded-tile bytes (sublane x lane padding) and take the cheapest.
    """
    sub = _min_sublane(dtype)
    total = 1
    for d in shape:
        total *= int(d)
    desired_steps = 4 * num_tc if num_tc > 1 else 2

    if total % _LANE == 0:
        best, best_score = None, None
        max_cols = min(total, 16384)
        for cols in range(_LANE, max_cols + 1, _LANE):
            if total % cols:
                continue
            rows = total // cols
            score = (
                rows >= sub,                   # full sublane occupancy
                512 <= cols <= 4096,           # lane-dense, not sublane-starved
                rows >= sub * desired_steps,   # room for a multi-step grid
                -abs(cols - 1024),             # mild preference for ~1024 lanes
            )
            if best_score is None or score > best_score:
                best_score, best = score, (rows, cols)
        return best

    # total % 128 != 0: choose the contiguous split with the least padding.
    best, best_key = None, None
    for i in range(len(shape) + 1):
        rows = 1
        for d in shape[:i]:
            rows *= int(d)
        cols = total // rows
        padded = _round_up(rows, sub) * _round_up(cols, _LANE)
        key = (padded, rows < sub, -cols)
        if best_key is None or key < best_key:
            best_key, best = key, (rows, cols)
    return best


def _pick_row_tile(rows: int, cols: int, dtype, num_tc: int) -> int:
    sub = _min_sublane(dtype)
    itemsize = jnp.dtype(dtype).itemsize
    bytes_per_row = cols * itemsize

    # Cap each tile at ~2 MiB: streaming saturates HBM well below this, and
    # smaller tiles keep the grid long (pipelined) and the VMEM footprint low.
    cap_rows = max(sub, (_TILE_CAP_BYTES // bytes_per_row) // sub * sub)
    row_tile = min(rows, cap_rows)

    if num_tc > 1 and rows >= 2 * sub:
        # Megacore (v7x): target >= 4 steps per TensorCore, but never shrink a
        # tile below ~1 MiB or one sublane group, and always expose >= 2 steps
        # so both cores stream.
        floor_rows = max(sub, _round_up(-(-_TILE_MIN_BYTES // bytes_per_row), sub))
        target_rows = max(_round_up(-(-rows // (4 * num_tc)), sub), floor_rows)
        two_step_rows = _round_up(-(-rows // 2), sub)
        target_rows = min(target_rows, two_step_rows)
        row_tile = min(row_tile, max(sub, target_rows))

    if row_tile < rows:
        row_tile = max(sub, (row_tile // sub) * sub)
    return min(row_tile, rows)


def _vmem_limit_bytes(row_tile: int, cols: int, dtype) -> int:
    """Scoped-VMEM request sized from actual need, not physical capacity."""
    itemsize = jnp.dtype(dtype).itemsize
    sub = _min_sublane(dtype)
    padded_tile = _round_up(row_tile, sub) * _round_up(cols, _LANE) * itemsize
    need = 4 * padded_tile  # in + out, double-buffered
    return min(max(2 * need, 32 * 1024 * 1024), 64 * 1024 * 1024)


def _relu_2d(x2d: jax.Array, row_tile: int) -> jax.Array:
    rows, cols = x2d.shape
    itemsize = jnp.dtype(x2d.dtype).itemsize
    grid = (pl.cdiv(rows, row_tile),)
    return pl.pallas_call(
        _relu_kernel,
        out_shape=jax.ShapeDtypeStruct((rows, cols), x2d.dtype),
        grid_spec=pltpu.PrefetchScalarGridSpec(
            num_scalar_prefetch=0,
            grid=grid,
            in_specs=[pl.BlockSpec((row_tile, cols), lambda i: (i, 0))],
            out_specs=pl.BlockSpec((row_tile, cols), lambda i: (i, 0)),
        ),
        compiler_params=pltpu.CompilerParams(
            dimension_semantics=("parallel",),
            vmem_limit_bytes=_vmem_limit_bytes(row_tile, cols, x2d.dtype),
        ),
        cost_estimate=pl.CostEstimate(
            flops=rows * cols,
            transcendentals=0,
            bytes_accessed=2 * rows * cols * itemsize,
        ),
    )(x2d)


def quaternion_relu(x: jax.Array) -> jax.Array:
    """Equivalent of Relu.forward: chunk dim=1 into 4, relu each, concat."""
    n, c, h, w = x.shape
    assert c % 4 == 0, "channel dim must be divisible by 4 (quaternion parts)"

    num_tc = _num_tensorcores()
    rows, cols = _pick_2d_shape((n, c, h, w), x.dtype, num_tc)
    row_tile = _pick_row_tile(rows, cols, x.dtype, num_tc)

    y2d = _relu_2d(x.reshape(rows, cols), row_tile)
    return y2d.reshape(n, c, h, w)


def _reference(x: jax.Array) -> jax.Array:
    r, i, j, k = jnp.split(x, 4, axis=1)
    return jnp.concatenate(
        [jnp.maximum(r, 0), jnp.maximum(i, 0), jnp.maximum(j, 0), jnp.maximum(k, 0)],
        axis=1,
    )


if __name__ == "__main__":
    key = jax.random.PRNGKey(0)

    # Primary: small NCHW input consistent with the module (batch=2,
    # channels=4 -> one channel per quaternion component, spatial 16x16).
    x = jax.random.normal(key, (2, 4, 16, 16), dtype=jnp.float32)
    y = jax.block_until_ready(quaternion_relu(x))
    assert y.shape == x.shape and y.dtype == x.dtype
    assert jnp.allclose(y, _reference(x)), "mismatch vs reference (f32)"

    # Secondary: bf16 with total not a multiple of 128 (exercises the ragged
    # fallback factorization and the dtype-dependent minimum sublane count).
    k2 = jax.random.PRNGKey(1)
    x2 = jax.random.normal(k2, (2, 8, 14, 14), dtype=jnp.bfloat16)
    y2 = jax.block_until_ready(quaternion_relu(x2))
    assert y2.shape == x2.shape and y2.dtype == x2.dtype
    assert jnp.allclose(
        y2.astype(jnp.float32), _reference(x2).astype(jnp.float32)
    ), "mismatch vs reference (bf16)"

    print("KERNEL_OK")
</pallas_src>

<mosaic_0001>
module attributes {stable_mosaic.version = 11 : i64} {
  func.func @_relu_kernel(%arg0: i32, %arg1: memref<16x128xf32, #tpu.memory_space<vmem>>, %arg2: memref<16x128xf32, #tpu.memory_space<vmem>>) attributes {dimension_semantics = [#tpu.dimension_semantics<parallel>], iteration_bounds = array<i64: 1>, scalar_prefetch = 0 : i64, scratch_operands = 0 : i64, tpu.core_type = #tpu.core_type<tc>, window_params = [{transform_indices = @transform_0, window_bounds = array<i64: 16, 128>}, {transform_indices = @transform_1, window_bounds = array<i64: 16, 128>}]} {
    %c0 = arith.constant 0 : index
    %c0_0 = arith.constant 0 : index
    %0 = vector.load %arg1[%c0, %c0_0] : memref<16x128xf32, #tpu.memory_space<vmem>>, vector<16x128xf32>
    %cst = arith.constant 0.000000e+00 : f32
    %1 = vector.broadcast %cst : f32 to vector<16x128xf32>
    %2 = arith.maximumf %0, %1 : vector<16x128xf32>
    %c0_1 = arith.constant 0 : index
    %c0_2 = arith.constant 0 : index
    %3 = vector.load %arg2[%c0_1, %c0_2] : memref<16x128xf32, #tpu.memory_space<vmem>>, vector<16x128xf32>
    tpu.vector_store %arg2[%c0_1, %c0_2], %2 {strides = array<i32>} : memref<16x128xf32, #tpu.memory_space<vmem>>, vector<16x128xf32>,
    return
  }
  func.func @transform_0(%arg0: i32) -> (i32, i32) {
    %c0_i32 = arith.constant 0 : i32
    %c0_i32_0 = arith.constant 0 : i32
    return %arg0, %c0_i32 : i32, i32
  }
  func.func @transform_1(%arg0: i32) -> (i32, i32) {
    %c0_i32 = arith.constant 0 : i32
    %c0_i32_0 = arith.constant 0 : i32
    return %arg0, %c0_i32 : i32, i32
  }
}

</mosaic_0001>

<bundles_post_ra>
// kernel: tpu_custom_call.1
= control target key start
LH: loop header
LB: loop body
LE: loop exit
PB: predicated region body
PF: predicated region fallthrough
CT: control target
= control target key end

     0   :  { %6 = vsyncpa [#allocation3], 0  ;;  %s136_s0 = inlined_call_operand.hbm [shape: f32[16,128], index: 0, kind: input, shape index: {}]   ;;  %s137_s1 = inlined_call_operand.hbm [shape: f32[16,128], index: 1, kind: output, shape index: {}]  }
   0x1   :  { %7 = vsyncpa [#allocation4], 0  ;;  %s98_s6 = smov [#allocation2]   ;;  %s50_s10 = scalar_lea.hbm %s136_s0, 256 }
   0x2   :  { %s13_s7 = sshll.u32 %s98_s6, 4  ;;  %p51_p0 = scmp.ne.s32.totalorder %s136_s0, %s50_s10  ;;  %s14_s7 = int_to_ptr.vmem [resolvable:$true] %s13_s7 }
   0x3   :  { %p54_p1 = scmp.lt.u32.totalorder %s50_s10, %s136_s0 }
   0x5   :  { %p56_p2 = pnand %p54_p1, %p51_p0 }
   0x7   :  { %59 = shalt.err (!%p56_p2)
}
   0x8   :  { %s60_s15 = scalar_lea.vmem %s14_s7, 256  ;;  %p65_p4 = scmp.lt.s32.totalorder %s14_s7, %s14_s7 }
   0x9   :  { %p61_p3 = scmp.ne.s32.totalorder %s14_s7, %s60_s15  ;;  %p66_p5 = scmp.lt.s32.totalorder %s60_s15, %s60_s15 }
   0xb   :  { %p67_p6 = por %p66_p5, %p65_p4 }
   0xd   :  { %p68_p7 = pnand %p67_p6, %p61_p3 }
   0xf   :  { %71 = shalt.err (!%p68_p7)
}
  0x10   :  { %s99_s16 = smov 128   ;;  %s100_s17 = smov 8  }
  0x11   :  { %19 = dma.hbm_to_vmem [thread:$0]  %s136_s0, 256, %s14_s7, [#allocation3], %s99_s16, %s99_s16, %s100_s17  }
  0x12   :  { %94 = dma.done.wait [#allocation3], 256  }
  0x13   :  { %95 = vsyncadd [#allocation3], 4294967040  ;;  %s101_s20 = smov [#allocation5]   ;;  %v23_v0 = vld [vmem:[#allocation2] sm:$0xff]  ;;  %v24_v1 = vld [vmem:[#allocation2 + $0x8] sm:$0xff] }
  0x14   :  { %s34_s21 = sshll.u32 %s101_s20, 4  ;;  %v25_v2 = vmax.f32 %v23_v0, 0.0  ;;  %v26_v3 = vmax.f32 %v24_v1, 0.0  ;;  %s35_s21 = int_to_ptr.vmem [resolvable:$true] %s34_s21 }
  0x15   :  { %s72_s22 = scalar_lea.vmem %s35_s21, 256  ;;  %p77_p9 = scmp.lt.s32.totalorder %s35_s21, %s35_s21 }
  0x16   :  { %27 = vst [vmem:[#allocation5] sm:$0xff] %v25_v2  ;;  %28 = vst [vmem:[#allocation5 + $0x8] sm:$0xff] %v26_v3  ;;  %p73_p8 = scmp.ne.s32.totalorder %s35_s21, %s72_s22  ;;  %p78_p10 = scmp.lt.s32.totalorder %s72_s22, %s72_s22 }
  0x18   :  { %p79_p11 = por %p78_p10, %p77_p9 }
  0x1a   :  { %p80_p12 = pnand %p79_p11, %p73_p8 }
  0x1c   :  { %83 = shalt.err (!%p80_p12)
}
  0x1d   :  { %s84_s24 = scalar_lea.hbm %s137_s1, 256 }
  0x1e   :  { %p85_p13 = scmp.ne.s32.totalorder %s137_s1, %s84_s24  ;;  %p88_p0 = scmp.lt.u32.totalorder %s84_s24, %s137_s1 }
  0x20   :  { %p90_p1 = pnand %p88_p0, %p85_p13 }
  0x22   :  { %93 = shalt.err (!%p90_p1)
}
  0x23   :  { %40 = dma.vmem_to_hbm [thread:$0]  %s35_s21, 256, %s137_s1, [#allocation4], %s99_s16, %s99_s16, %s100_s17  }
  0x24   :  { %96 = dma.done.wait [#allocation4], 256  }
  0x25   :  { %97 = vsyncadd [#allocation4], 4294967040 }
  0x26   :  { %44 = vsyncpa [#allocation3], 1 }
  0x27   :  { %45 = vsyncpa [#allocation4], 1 }

</bundles_post_ra>
